<compile_context>
chip_gen: v7x
topology: tpu7x:2x2x1
jax: 0.10.0
libtpu: 0.0.40
codegen_flags: <defaults>
</compile_context>

<pallas_src>
import functools

import jax
import jax.numpy as jnp
from jax import lax
from jax.experimental import pallas as pl
from jax.experimental.pallas import tpu as pltpu


def _attention_kernel(x_ref, wq_ref, wk_ref, wv_ref, wproj_ref, bproj_ref,
                      o_ref, *, num_heads, compute_dtype, approx_recip):
    bt, N, C = x_ref.shape
    H = num_heads
    hd = C // H
    cdt = compute_dtype

    def process_one(b):
        xb = x_ref[b].astype(cdt)                                  # (N, C)

        # Q/K/V projections against VMEM-resident weights (scale pre-folded
        # into w_q); f32 MXU accumulation.
        q = jnp.dot(xb, wq_ref[...], preferred_element_type=jnp.float32)
        k = jnp.dot(xb, wk_ref[...], preferred_element_type=jnp.float32)
        v = jnp.dot(xb, wv_ref[...], preferred_element_type=jnp.float32)

        q3 = q.reshape(N, H, hd).astype(cdt)
        k3 = k.reshape(N, H, hd).astype(cdt)
        v3 = v.reshape(N, H, hd).astype(cdt)

        # Head-batched Q K^T: attn[h, n, m] = sum_d q[n,h,d] * k[m,h,d]
        attn = jnp.einsum('nhd,mhd->hnm', q3, k3,
                          preferred_element_type=jnp.float32)      # (H, N, N) f32

        # Numerically stable softmax; elementwise math stays f32 (v5e-safe).
        m = jnp.max(attn, axis=-1, keepdims=True)
        e = jnp.exp(attn - m)
        s = jnp.sum(e, axis=-1, keepdims=True)
        if approx_recip:
            p = e * pl.reciprocal(s, approx=True)   # EUP slot (bf16 fast path)
        else:
            p = e / s                               # exact divide (f32 path)
        # attn_drop: ratio 0.0 -> identity

        # Head-batched attn @ V: ctx[n, h, d] = sum_m p[h,n,m] * v[m,h,d]
        ctx = jnp.einsum('hnm,mhd->nhd', p.astype(cdt), v3,
                         preferred_element_type=jnp.float32)       # (N, H, hd)
        ctx = ctx.reshape(N, C)

        # Output projection; bias added after f32 accumulation.
        y = jnp.dot(ctx.astype(cdt), wproj_ref[...],
                    preferred_element_type=jnp.float32) + bproj_ref[...]
        # proj_drop: ratio 0.0 -> identity
        o_ref[b] = y.astype(o_ref.dtype)

    if bt == 1:
        process_one(0)
    else:
        def body(b, carry):
            process_one(b)
            return carry
        lax.fori_loop(0, bt, body, 0)


def _vmem_limit_bytes():
    """Scoped VMEM limit: ~3/4 of physical VMEM, capped at 100 MiB."""
    cap = 64 << 20  # conservative default = v7x per-TensorCore VMEM
    try:
        info = pltpu.get_tpu_info()
        cap = int(getattr(info, "vmem_capacity_bytes", cap)) or cap
    except Exception:
        pass
    return int(min((cap * 3) // 4, 100 << 20))


def _pick_b_tile(B, N, C, H, x_bytes, out_bytes, w_bytes, vmem_limit):
    """Largest divisor of B whose per-step footprint fits the VMEM budget,
    capped at B//2 so the parallel grid axis has >=2 steps (v7x dual-TC)."""
    weights = (4 * C * C + C) * w_bytes                    # w_q,w_k,w_v,w_proj,bias
    per_b_live = (3 * N * C * 4 + 3 * N * C * x_bytes      # q/k/v f32 + cdt copies
                  + 2 * H * N * N * 4                      # attn + exp(attn)
                  + 2 * N * C * 4)                         # context (+ cast)
    per_b_io = 2 * N * C * (x_bytes + out_bytes)           # double-buffered x / y
    budget = vmem_limit - weights - per_b_live
    cap = max(1, budget // per_b_io) if budget > 0 else 1
    cap = min(cap, max(1, B // 2))
    bt = 1
    for d in range(1, B + 1):
        if B % d == 0 and d <= cap:
            bt = d
    return bt


def attention_pallas(x, w_qkv, w_proj, b_proj, *, num_heads,
                     b_tile=None, compute_dtype=jnp.bfloat16):
    """x: (B, N, C); w_qkv: (C, 3C); w_proj: (C, C); b_proj: (C,)."""
    B, N, C = x.shape
    assert C % num_heads == 0
    hd = C // num_heads
    scale = hd ** (-0.5)

    # Split QKV weight host-side; fold softmax scale into w_q (in f32, before
    # any bf16 cast) so the kernel never slices a (N, 3C) intermediate and
    # never runs the per-element scale multiply.
    w_q = (w_qkv[:, 0 * C:1 * C] * scale).astype(compute_dtype)
    w_k = w_qkv[:, 1 * C:2 * C].astype(compute_dtype)
    w_v = w_qkv[:, 2 * C:3 * C].astype(compute_dtype)
    w_p = w_proj.astype(compute_dtype)
    b_p = b_proj.reshape(1, C).astype(jnp.float32)

    out_dtype = x.dtype
    # Hand activations to the kernel in the MXU compute dtype (halves x DMA
    # and the double-buffered input block when bf16).
    x_in = x if x.dtype == compute_dtype else x.astype(compute_dtype)

    x_bytes = jnp.dtype(compute_dtype).itemsize
    out_bytes = jnp.dtype(out_dtype).itemsize
    w_bytes = x_bytes

    vmem_limit = _vmem_limit_bytes()
    if b_tile is None:
        b_tile = _pick_b_tile(B, N, C, num_heads, x_bytes, out_bytes, w_bytes,
                              vmem_limit)
    assert B % b_tile == 0
    grid = (B // b_tile,)

    kernel = functools.partial(
        _attention_kernel,
        num_heads=num_heads,
        compute_dtype=compute_dtype,
        approx_recip=(compute_dtype != jnp.float32))

    # Loop-invariant weights: whole-array VMEM residents (single-buffered).
    vmem_whole = pl.BlockSpec(memory_space=pltpu.MemorySpace.VMEM)

    flops = 2 * B * N * C * 3 * C + 4 * B * N * N * C + 2 * B * N * C * C
    cost = pl.CostEstimate(
        flops=flops,
        transcendentals=B * num_heads * N * N,
        bytes_accessed=B * N * C * (x_bytes + out_bytes) + (4 * C * C + C) * w_bytes)

    y = pl.pallas_call(
        kernel,
        out_shape=jax.ShapeDtypeStruct((B, N, C), out_dtype),
        grid_spec=pltpu.PrefetchScalarGridSpec(
            num_scalar_prefetch=0,
            grid=grid,
            in_specs=[
                # 3-D block; last two dims equal full array dims -> no (8,128)
                # divisibility hazard even for ViT's N=197.
                pl.BlockSpec((b_tile, N, C), lambda b: (b, 0, 0)),   # x
                vmem_whole,                                          # w_q
                vmem_whole,                                          # w_k
                vmem_whole,                                          # w_v
                vmem_whole,                                          # w_proj
                vmem_whole,                                          # b_proj
            ],
            out_specs=pl.BlockSpec((b_tile, N, C), lambda b: (b, 0, 0)),
        ),
        compiler_params=pltpu.CompilerParams(
            dimension_semantics=("parallel",),
            vmem_limit_bytes=vmem_limit),
        cost_estimate=cost,
    )(x_in, w_q, w_k, w_v, w_p, b_p)

    return y


def attention_ref(x, w_qkv, w_proj, b_proj, *, num_heads):
    """Pure-JAX reference matching the PyTorch forward."""
    B, N, C = x.shape
    hd = C // num_heads
    scale = hd ** (-0.5)
    qkv = x @ w_qkv                                            # (B, N, 3C)
    qkv = qkv.reshape(B, N, 3, num_heads, hd).transpose(2, 0, 3, 1, 4)
    q, k, v = qkv[0], qkv[1], qkv[2]                           # (B, H, N, hd)
    attn = (q @ jnp.swapaxes(k, -2, -1)) * scale               # (B, H, N, N)
    attn = jax.nn.softmax(attn, axis=-1)
    out = (attn @ v).transpose(0, 2, 1, 3).reshape(B, N, C)
    return out @ w_proj + b_proj


if __name__ == "__main__":
    # Small shapes consistent with the module: dim=C=32, num_heads=8 -> head_dim=4
    B, N, C = 4, 8, 32
    num_heads = 8

    key = jax.random.PRNGKey(0)
    kx, kw1, kw2, kb = jax.random.split(key, 4)

    x = jax.random.normal(kx, (B, N, C), dtype=jnp.float32)
    w_qkv = jax.random.normal(kw1, (C, 3 * C), dtype=jnp.float32) * 0.05
    w_proj = jax.random.normal(kw2, (C, C), dtype=jnp.float32) * 0.05
    b_proj = jax.random.normal(kb, (C,), dtype=jnp.float32) * 0.01

    y_ref = attention_ref(x, w_qkv, w_proj, b_proj, num_heads=num_heads)

    # 1) f32 MXU inputs, auto b_tile (capped at B//2 -> exercises the in-kernel
    #    batch loop and the 2-step parallel grid).  Exact softmax divide.
    y_f32 = attention_pallas(x, w_qkv, w_proj, b_proj, num_heads=num_heads,
                             compute_dtype=jnp.float32)
    y_f32 = jax.block_until_ready(y_f32)
    assert jnp.allclose(y_f32, y_ref, atol=5e-3, rtol=5e-3), "f32 kernel mismatch"

    # 2) bf16 MXU inputs + f32 accumulation (v6e/v7x fast path), b_tile=1 so the
    #    whole batch is on the grid (exercises the single-b path).
    y_bf16 = attention_pallas(x, w_qkv, w_proj, b_proj, num_heads=num_heads,
                              compute_dtype=jnp.bfloat16, b_tile=1)
    y_bf16 = jax.block_until_ready(y_bf16)
    assert jnp.allclose(y_bf16, y_ref, atol=3e-2, rtol=3e-2), "bf16 kernel mismatch"

    print("KERNEL_OK")
</pallas_src>

<mosaic_0001>
module attributes {stable_mosaic.version = 11 : i64} {
  func.func @_attention_kernel(%arg0: i32, %arg1: memref<2x8x32xf32, #tpu.memory_space<vmem>>, %arg2: memref<32x32xf32, #tpu.memory_space<vmem>>, %arg3: memref<32x32xf32, #tpu.memory_space<vmem>>, %arg4: memref<32x32xf32, #tpu.memory_space<vmem>>, %arg5: memref<32x32xf32, #tpu.memory_space<vmem>>, %arg6: memref<1x32xf32, #tpu.memory_space<vmem>>, %arg7: memref<2x8x32xf32, #tpu.memory_space<vmem>>) attributes {dimension_semantics = [#tpu.dimension_semantics<parallel>], iteration_bounds = array<i64: 2>, scalar_prefetch = 0 : i64, scratch_operands = 0 : i64, tpu.core_type = #tpu.core_type<tc>, window_params = [{transform_indices = @transform_0, window_bounds = array<i64: 2, 8, 32>}, {pipeline_mode = #tpu.pipeline_mode<synchronous>, transform_indices = @transform_1, window_bounds = array<i64: 32, 32>}, {pipeline_mode = #tpu.pipeline_mode<synchronous>, transform_indices = @transform_2, window_bounds = array<i64: 32, 32>}, {pipeline_mode = #tpu.pipeline_mode<synchronous>, transform_indices = @transform_3, window_bounds = array<i64: 32, 32>}, {pipeline_mode = #tpu.pipeline_mode<synchronous>, transform_indices = @transform_4, window_bounds = array<i64: 32, 32>}, {pipeline_mode = #tpu.pipeline_mode<synchronous>, transform_indices = @transform_5, window_bounds = array<i64: 1, 32>}, {transform_indices = @transform_6, window_bounds = array<i64: 2, 8, 32>}]} {
    %c0_i32 = arith.constant 0 : i32
    %c2_i32 = arith.constant 2 : i32
    %0 = arith.addi %c0_i32, %c2_i32 : i32
    %c1_i32 = arith.constant 1 : i32
    scf.for %arg8 = %c0_i32 to %0 step %c1_i32  : i32 {
      %1 = arith.index_cast %arg8 : i32 to index
      %c0 = arith.constant 0 : index
      %c0_1 = arith.constant 0 : index
      %2 = vector.load %arg1[%1, %c0, %c0_1] : memref<2x8x32xf32, #tpu.memory_space<vmem>>, vector<1x8x32xf32>
      %3 = vector.shape_cast %2 : vector<1x8x32xf32> to vector<8x32xf32>
      %c0_2 = arith.constant 0 : index
      %c0_3 = arith.constant 0 : index
      %4 = vector.load %arg2[%c0_2, %c0_3] : memref<32x32xf32, #tpu.memory_space<vmem>>, vector<32x32xf32>
      %cst = arith.constant dense<0.000000e+00> : vector<8x32xf32>
      %5 = tpu.matmul %3, %4, %cst {dimension_numbers = #tpu.dot_dimension_numbers<[1], [0], [0], [1], [0, 0, 1, 1], [], []>} : vector<8x32xf32>, vector<32x32xf32>, vector<8x32xf32> -> vector<8x32xf32>
      %c0_4 = arith.constant 0 : index
      %c0_5 = arith.constant 0 : index
      %6 = vector.load %arg3[%c0_4, %c0_5] : memref<32x32xf32, #tpu.memory_space<vmem>>, vector<32x32xf32>
      %cst_6 = arith.constant dense<0.000000e+00> : vector<8x32xf32>
      %7 = tpu.matmul %3, %6, %cst_6 {dimension_numbers = #tpu.dot_dimension_numbers<[1], [0], [0], [1], [0, 0, 1, 1], [], []>} : vector<8x32xf32>, vector<32x32xf32>, vector<8x32xf32> -> vector<8x32xf32>
      %c0_7 = arith.constant 0 : index
      %c0_8 = arith.constant 0 : index
      %8 = vector.load %arg4[%c0_7, %c0_8] : memref<32x32xf32, #tpu.memory_space<vmem>>, vector<32x32xf32>
      %cst_9 = arith.constant dense<0.000000e+00> : vector<8x32xf32>
      %9 = tpu.matmul %3, %8, %cst_9 {dimension_numbers = #tpu.dot_dimension_numbers<[1], [0], [0], [1], [0, 0, 1, 1], [], []>} : vector<8x32xf32>, vector<32x32xf32>, vector<8x32xf32> -> vector<8x32xf32>
      %10 = vector.shape_cast %5 : vector<8x32xf32> to vector<8x8x4xf32>
      %11 = vector.shape_cast %7 : vector<8x32xf32> to vector<8x8x4xf32>
      %12 = vector.shape_cast %9 : vector<8x32xf32> to vector<8x8x4xf32>
      "tpu.trace_start"() <{level = 10 : i32, message = "nhd,mhd->hnm"}> : () -> ()
      %cst_10 = arith.constant dense<0.000000e+00> : vector<8x8x8xf32>
      %13 = tpu.matmul %10, %11, %cst_10 {dimension_numbers = #tpu.dot_dimension_numbers<[2], [2], [0], [0], [0, 1, 0, 0, 1, 0], [1], [1]>} : vector<8x8x4xf32>, vector<8x8x4xf32>, vector<8x8x8xf32> -> vector<8x8x8xf32>
      "tpu.trace_stop"() : () -> ()
      %cst_11 = arith.constant dense<0xFF800000> : vector<8x8xf32>
      %14 = vector.multi_reduction <maximumf>, %13, %cst_11 [2] : vector<8x8x8xf32> to vector<8x8xf32>
      %15 = vector.shape_cast %14 : vector<8x8xf32> to vector<8x8x1xf32>
      %16 = vector.broadcast %15 : vector<8x8x1xf32> to vector<8x8x8xf32>
      %17 = arith.subf %13, %16 : vector<8x8x8xf32>
      %18 = math.exp %17 : vector<8x8x8xf32>
      %cst_12 = arith.constant dense<0.000000e+00> : vector<8x8xf32>
      %19 = vector.multi_reduction <add>, %18, %cst_12 [2] : vector<8x8x8xf32> to vector<8x8xf32>
      %20 = vector.shape_cast %19 : vector<8x8xf32> to vector<8x8x1xf32>
      %21 = vector.broadcast %20 : vector<8x8x1xf32> to vector<8x8x8xf32>
      %22 = arith.divf %18, %21 : vector<8x8x8xf32>
      "tpu.trace_start"() <{level = 10 : i32, message = "hnm,mhd->nhd"}> : () -> ()
      %cst_13 = arith.constant dense<0.000000e+00> : vector<8x4x8xf32>
      %23 = tpu.matmul %12, %22, %cst_13 {dimension_numbers = #tpu.dot_dimension_numbers<[0], [2], [2], [1], [0, 1, 0, 2, 1, 1], [1], [0]>} : vector<8x8x4xf32>, vector<8x8x8xf32>, vector<8x4x8xf32> -> vector<8x4x8xf32>
      %24 = tpu.transpose %23, [2, 0, 1] : vector<8x4x8xf32> -> vector<8x8x4xf32>
      "tpu.trace_stop"() : () -> ()
      %25 = vector.shape_cast %24 : vector<8x8x4xf32> to vector<8x32xf32>
      %c0_14 = arith.constant 0 : index
      %c0_15 = arith.constant 0 : index
      %26 = vector.load %arg5[%c0_14, %c0_15] : memref<32x32xf32, #tpu.memory_space<vmem>>, vector<32x32xf32>
      %cst_16 = arith.constant dense<0.000000e+00> : vector<8x32xf32>
      %27 = tpu.matmul %25, %26, %cst_16 {dimension_numbers = #tpu.dot_dimension_numbers<[1], [0], [0], [1], [0, 0, 1, 1], [], []>} : vector<8x32xf32>, vector<32x32xf32>, vector<8x32xf32> -> vector<8x32xf32>
      %c0_17 = arith.constant 0 : index
      %c0_18 = arith.constant 0 : index
      %28 = vector.load %arg6[%c0_17, %c0_18] : memref<1x32xf32, #tpu.memory_space<vmem>>, vector<1x32xf32>
      %29 = vector.broadcast %28 : vector<1x32xf32> to vector<8x32xf32>
      %30 = arith.addf %27, %29 : vector<8x32xf32>
      %31 = arith.index_cast %arg8 : i32 to index
      %c0_19 = arith.constant 0 : index
      %c0_20 = arith.constant 0 : index
      %32 = vector.load %arg7[%31, %c0_19, %c0_20] : memref<2x8x32xf32, #tpu.memory_space<vmem>>, vector<1x8x32xf32>
      %33 = vector.shape_cast %32 : vector<1x8x32xf32> to vector<8x32xf32>
      %34 = vector.shape_cast %30 : vector<8x32xf32> to vector<1x8x32xf32>
      tpu.vector_store %arg7[%31, %c0_19, %c0_20], %34 {strides = array<i32>} : memref<2x8x32xf32, #tpu.memory_space<vmem>>, vector<1x8x32xf32>,
    }
    %c2_i32_0 = arith.constant 2 : i32
    return
  }
  func.func @transform_0(%arg0: i32) -> (i32, i32, i32) {
    %c0_i32 = arith.constant 0 : i32
    %c0_i32_0 = arith.constant 0 : i32
    %c0_i32_1 = arith.constant 0 : i32
    return %arg0, %c0_i32, %c0_i32_0 : i32, i32, i32
  }
  func.func @transform_1(%arg0: i32) -> (i32, i32) {
    %c0_i32 = arith.constant 0 : i32
    %c0_i32_0 = arith.constant 0 : i32
    %c0_i32_1 = arith.constant 0 : i32
    return %c0_i32, %c0_i32_0 : i32, i32
  }
  func.func @transform_2(%arg0: i32) -> (i32, i32) {
    %c0_i32 = arith.constant 0 : i32
    %c0_i32_0 = arith.constant 0 : i32
    %c0_i32_1 = arith.constant 0 : i32
    return %c0_i32, %c0_i32_0 : i32, i32
  }
  func.func @transform_3(%arg0: i32) -> (i32, i32) {
    %c0_i32 = arith.constant 0 : i32
    %c0_i32_0 = arith.constant 0 : i32
    %c0_i32_1 = arith.constant 0 : i32
    return %c0_i32, %c0_i32_0 : i32, i32
  }
  func.func @transform_4(%arg0: i32) -> (i32, i32) {
    %c0_i32 = arith.constant 0 : i32
    %c0_i32_0 = arith.constant 0 : i32
    %c0_i32_1 = arith.constant 0 : i32
    return %c0_i32, %c0_i32_0 : i32, i32
  }
  func.func @transform_5(%arg0: i32) -> (i32, i32) {
    %c0_i32 = arith.constant 0 : i32
    %c0_i32_0 = arith.constant 0 : i32
    %c0_i32_1 = arith.constant 0 : i32
    return %c0_i32, %c0_i32_0 : i32, i32
  }
  func.func @transform_6(%arg0: i32) -> (i32, i32, i32) {
    %c0_i32 = arith.constant 0 : i32
    %c0_i32_0 = arith.constant 0 : i32
    %c0_i32_1 = arith.constant 0 : i32
    return %arg0, %c0_i32, %c0_i32_0 : i32, i32, i32
  }
}

</mosaic_0001>

<bundles_post_ra>
// kernel: tpu_custom_call.1
= control target key start
LH: loop header
LB: loop body
LE: loop exit
PB: predicated region body
PF: predicated region fallthrough
CT: control target
= control target key end

     0   :  { %11 = vsyncpa [#allocation3], 0  ;;  %s4448_s0 = inlined_call_operand.hbm [shape: f32[4,8,32], index: 0, kind: input, shape index: {}]   ;;  %s4449_s1 = inlined_call_operand.hbm [shape: f32[32,32], index: 1, kind: input, shape index: {}]   ;;  %s4450_s2 = inlined_call_operand.hbm [shape: f32[32,32], index: 2, kind: input, shape index: {}]   ;;  %s4451_s3 = inlined_call_operand.hbm [shape: f32[32,32], index: 3, kind: input, shape index: {}]   ;;  %s4452_s4 = inlined_call_operand.hbm [shape: f32[32,32], index: 4, kind: input, shape index: {}]   ;;  %s4453_s5 = inlined_call_operand.vmem [shape: f32[1,32], index: 5, kind: input, shape index: {}]   ;;  %s4454_s6 = inlined_call_operand.hbm [shape: f32[4,8,32], index: 6, kind: output, shape index: {}]  }
   0x1   :  { %13 = vsyncpa [#allocation3 + $0x1], 0 }
   0x2   :  { %14 = vsyncpa [#allocation6], 0 }
   0x3   :  { %15 = vsyncpa [#allocation9], 0 }
   0x4   :  { %16 = vsyncpa [#allocation4], 0 }
   0x5   :  { %18 = vsyncpa [#allocation4 + $0x1], 0  ;;  %s3933_s21 = smov 0   ;;  %s3935_s22 = smov 0  }
   0x6   :  { %s3937_s23 = smov 0   ;;  %s3939_s24 = smov 0  }
   0x7 LB: > { %s3954_s25 = sadd.s32 4294967295, %s3863_s24   ;;  %s3223_s26 = sadd.s32 4294967294, %s3863_s24   ;;  %s3863_s24 = sphi %s3939_s24, %s4477_s24   ;;  %s3859_s23 = sphi %s3937_s23, %s4476_s23   ;;  %s3855_s22 = sphi %s3935_s22, %s4475_s22   ;;  %s3851_s21 = sphi %s3933_s21, %s4474_s21  }
   0x8   : > { %p44_p0 = scmp.ne.s32.totalorder %s3855_s22, %s3851_s21  ;;  %p4455_p1 = scmp.eq.s32.totalorder %s3954_s25, 0 }
   0x9   : > { %p179_p3 = scmp.eq.s32.totalorder %s3223_s26, 1  ;;  %p3224_p5 = scmp.ge.s32.totalorder %s3863_s24, 1 }
   0xa   : > { %p3963_p4 = por %p4455_p1, %p44_p0  ;;  %p186_p7 = scmp.lt.s32.totalorder %s3863_s24, 3 }
   0xb   : > { %p3968_p6 = por %p179_p3, %p44_p0  ;;  %s3869_s30 = smov [#allocation5]  }
   0xc   : > { %s4458_s27 = scalar_select %p3963_p4, 1, 0 }
   0xd   : > { %s4459_s28 = scalar_select %p3968_p6, 1, 0 }
   0xe   : > { %p3973_p8 = pnand %p3224_p5, %p186_p7  ;;  %s198_s7 = sshll.u32 %s3869_s30, 4  ;;  %s3977_s7 = int_to_ptr.vmem [resolvable:$true] %s198_s7 }
   0xf   : > { %s3870_s9 = smov [#allocation8]   ;;  %s3871_s11 = smov [#allocation7]  }
  0x10   : > { %s4460_s29 = scalar_select %p3973_p8, 1, 0 }
  0x11   : > { %p3513_p9 = pneg %p3973_p8  ;;  %s224_s10 = sshll.u32 %s3870_s9, 4  ;;  %s3988_s10 = int_to_ptr.vmem [resolvable:$true] %s224_s10 }
  0x12   : > { %s3990_s12 = sshll.u32 %s3871_s11, 4  ;;  %s3643_s15 = scalar_lea.hbm %s4449_s1, 512  ;;  %s212_s12 = int_to_ptr.vmem [resolvable:$true] %s3990_s12 }
  0x13   : > { %p3984_p11 = pnand %p3513_p9, %p4455_p1  ;;  %p3644_p12 = scmp.ne.s32.totalorder %s4449_s1, %s3643_s15 }
  0x14   : > { %p3650_p5 = scmp.lt.u32.totalorder %s3643_s15, %s4449_s1 }
  0x15   : > { %p4000_p13 = pneg %p3984_p11 }
  0x17   : > { %p3646_p0 = pnand %p4000_p13, %p3644_p12 }
  0x19   : > { %p3647_p3 = pneg %p3646_p0 }
  0x1b   : > { %p3652_p7 = pnand %p3650_p5, %p3647_p3 }
  0x1d   : > { %3655 = shalt.err (!%p3652_p7)
}
  0x1e   : > { %s3656_s26 = scalar_lea.vmem %s3977_s7, 512  ;;  %p3664_p2 = scmp.lt.s32.totalorder %s3977_s7, %s3977_s7 }
  0x1f   : > { %p3657_p9 = scmp.ne.s32.totalorder %s3977_s7, %s3656_s26  ;;  %p3665_p6 = scmp.lt.s32.totalorder %s3656_s26, %s3656_s26 }
  0x21   : > { %p3659_p10 = pnand %p3657_p9, %p4000_p13  ;;  %p3666_p12 = por %p3665_p6, %p3664_p2 }
  0x23   : > { %p3660_p1 = pneg %p3659_p10 }
  0x25   : > { %p3667_p0 = pnand %p3666_p12, %p3660_p1 }
  0x27   : > { %3670 = shalt.err (!%p3667_p0)
}
  0x28   : > { %s3872_s30 = smov 128   ;;  %s3873_s9 = smov 8  }
  0x29   : > { %3516 = dma.hbm_to_vmem [thread:$0]  (!%p3984_p11), %s4449_s1, 512, %s3977_s7, [#allocation6], %s3872_s30, %s3872_s30, %s3873_s9  }
  0x2a   : > { %s3671_s16 = scalar_lea.hbm %s4451_s3, 512 }
  0x2b   : > { %p3672_p1 = scmp.ne.s32.totalorder %s4451_s3, %s3671_s16  ;;  %p3678_p10 = scmp.lt.u32.totalorder %s3671_s16, %s4451_s3 }
  0x2d   : > { %p3674_p2 = pnand %p3672_p1, %p4000_p13 }
  0x2f   : > { %p3675_p6 = pneg %p3674_p2 }
  0x31   : > { %p3680_p3 = pnand %p3678_p10, %p3675_p6 }
  0x33   : > { %3683 = shalt.err (!%p3680_p3)
}
  0x34   : > { %s3684_s7 = scalar_lea.vmem %s3988_s10, 512  ;;  %p3692_p12 = scmp.lt.s32.totalorder %s3988_s10, %s3988_s10 }
  0x35   : > { %p3685_p5 = scmp.ne.s32.totalorder %s3988_s10, %s3684_s7  ;;  %p3693_p0 = scmp.lt.s32.totalorder %s3684_s7, %s3684_s7 }
  0x37   : > { %p3687_p7 = pnand %p3685_p5, %p4000_p13  ;;  %p3694_p1 = por %p3693_p0, %p3692_p12 }
  0x39   : > { %p3688_p9 = pneg %p3687_p7 }
  0x3b   : > { %p3695_p2 = pnand %p3694_p1, %p3688_p9 }
  0x3d   : > { %3698 = shalt.err (!%p3695_p2)
}
  0x3e   : > { %3522 = dma.hbm_to_vmem [thread:$0]  (!%p3984_p11), %s4451_s3, 512, %s3988_s10, [#allocation9], %s3872_s30, %s3872_s30, %s3873_s9  }
  0x3f   : > { %s3699_s16 = scalar_lea.hbm %s4450_s2, 512 }
  0x40   : > { %p3700_p6 = scmp.ne.s32.totalorder %s4450_s2, %s3699_s16  ;;  %p3706_p5 = scmp.lt.u32.totalorder %s3699_s16, %s4450_s2 }
  0x42   : > { %p3702_p10 = pnand %p3700_p6, %p4000_p13 }
  0x44   : > { %p3703_p3 = pneg %p3702_p10 }
  0x46   : > { %p3708_p7 = pnand %p3706_p5, %p3703_p3 }
  0x48   : > { %3711 = shalt.err (!%p3708_p7)
}
  0x49   : > { %s3712_s7 = scalar_lea.vmem %s212_s12, 512  ;;  %p3720_p1 = scmp.lt.s32.totalorder %s212_s12, %s212_s12 }
  0x4a   : > { %p3713_p9 = scmp.ne.s32.totalorder %s212_s12, %s3712_s7  ;;  %p3721_p2 = scmp.lt.s32.totalorder %s3712_s7, %s3712_s7 }
  0x4c   : > { %p3715_p12 = pnand %p3713_p9, %p4000_p13  ;;  %p3722_p4 = por %p3721_p2, %p3720_p1 }
  0x4e   : > { %p3716_p0 = pneg %p3715_p12 }
  0x50   : > { %p3723_p8 = pnand %p3722_p4, %p3716_p0 }
  0x52   : > { %3726 = shalt.err (!%p3723_p8)
}
  0x53   : > { %3519 = dma.hbm_to_vmem [thread:$0]  (!%p3984_p11), %s4450_s2, 512, %s212_s12, [#allocation6], %s3872_s30, %s3872_s30, %s3873_s9  }
  0x54   : > { %s3874_s13 = smov [#allocation10]   ;;  %s3727_s17 = scalar_lea.hbm %s4452_s4, 512 }
  0x55   : > { %s237_s14 = sshll.u32 %s3874_s13, 4  ;;  %p3728_p4 = scmp.ne.s32.totalorder %s4452_s4, %s3727_s17  ;;  %s238_s14 = int_to_ptr.vmem [resolvable:$true] %s237_s14 }
  0x56   : > { %p3734_p10 = scmp.lt.u32.totalorder %s3727_s17, %s4452_s4 }
  0x57   : > { %p3730_p8 = pnand %p3728_p4, %p4000_p13 }
  0x59   : > { %p3731_p6 = pneg %p3730_p8 }
  0x5b   : > { %p3736_p3 = pnand %p3734_p10, %p3731_p6 }
  0x5d   : > { %3739 = shalt.err (!%p3736_p3)
}
  0x5e   : > { %s3740_s12 = scalar_lea.vmem %s238_s14, 512  ;;  %p3748_p12 = scmp.lt.s32.totalorder %s238_s14, %s238_s14 }
  0x5f   : > { %p3741_p5 = scmp.ne.s32.totalorder %s238_s14, %s3740_s12  ;;  %p3749_p0 = scmp.lt.s32.totalorder %s3740_s12, %s3740_s12 }
  0x61   : > { %p3743_p7 = pnand %p3741_p5, %p4000_p13  ;;  %p3750_p1 = por %p3749_p0, %p3748_p12 }
  0x63   : > { %p3744_p9 = pneg %p3743_p7 }
  0x65   : > { %p3751_p2 = pnand %p3750_p1, %p3744_p9 }
  0x67   : > { %3754 = shalt.err (!%p3751_p2)
}
  0x68   : > { %3525 = dma.hbm_to_vmem [thread:$0]  (!%p3984_p11), %s4452_s4, 512, %s238_s14, [#allocation9], %s3872_s30, %s3872_s30, %s3873_s9  }
  0x69   : > { %s4094_s18 = sadd.s32 1, %s3863_s24   ;;  %s31_s8 = sadd.s32 1, %s3859_s23 }
  0x6a   : > { %s28_s13 = ssub.s32 %s3863_s24, %s4094_s18  ;;  %p38_p13 = scmp.ne.s32.totalorder %s3859_s23, %s3855_s22 }
  0x6b   : > { %p29_p4 = scmp.eq.s32.totalorder %s28_s13, 0  ;;  %p39_p8 = scmp.eq.s32.totalorder %s3863_s24, 0 }
  0x6c   : > { %p4463_p6 = scmp.eq.s32.totalorder %s3954_s25, 1  ;;  %p3538_p3 = scmp.lt.s32.totalorder %s3863_s24, 2 }
  0x6d   : > { %s4110_s16 = scalar_select %p29_p4, %s3859_s23, %s31_s8  }
  0x6e   : > { %p4104_p10 = por %p4463_p6, %p38_p13  ;;  %p40_p5 = por %p39_p8, %p38_p13 }
  0x6f   : > { %s254_s17 = sand.u32 1, %s3859_s23   ;;  %s3291_s14 = sshll.u32 %s3863_s24, 8 }
  0x70   : > { %s3230_s19 = sshll.u32 %s254_s17, 4  ;;  %s4117_s7 = scalar_lea.hbm %s4448_s0, %s3291_s14 }
  0x71   : > { %s258_s12 = scalar_lea.vmem [#allocation2], %s3230_s19  ;;  %p4121_p11 = pnand %p3538_p3, %p40_p5 }
  0x72   : > { %s265_s10 = sshll.u32 %s258_s12, 4  ;;  %s4125_s8 = scalar_lea.sflag [#allocation3], %s254_s17  ;;  %s4119_s10 = int_to_ptr.vmem [resolvable:$true] %s265_s10 }
  0x73   : > { %s3755_s13 = scalar_lea.hbm %s4117_s7, 256  ;;  %p3757_p9 = pneg %p4121_p11 }
  0x74   : > { %p3756_p7 = scmp.ne.s32.totalorder %s4117_s7, %s3755_s13  ;;  %s3760_s20 = scalar_lea.hbm %s4448_s0, 512 }
  0x75   : > { %p3761_p1 = scmp.lt.u32.totalorder %s4117_s7, %s4448_s0  ;;  %p3762_p2 = scmp.lt.u32.totalorder %s3760_s20, %s3755_s13 }
  0x76   : > { %p3758_p12 = pnand %p3757_p9, %p3756_p7  ;;  %p3764_p4 = scmp.lt.u32.totalorder %s3755_s13, %s4117_s7 }
  0x77   : > { %p3763_p13 = por %p3762_p2, %p3761_p1 }
  0x78   : > { %p3759_p0 = pneg %p3758_p12 }
  0x79   : > { %p3765_p8 = por %p3764_p4, %p3763_p13 }
  0x7b   : > { %p3766_p6 = pnand %p3765_p8, %p3759_p0 }
  0x7d   : > { %3769 = shalt.err (!%p3766_p6)
}
  0x7e   : > { %s3770_s17 = scalar_lea.vmem %s4119_s10, 256  ;;  %s3875_s19 = smov [#allocation2]  }
  0x7f   : > { %p3771_p3 = scmp.ne.s32.totalorder %s4119_s10, %s3770_s17  ;;  %s3775_s14 = sshll.u32 %s3875_s19, 4  ;;  %s3776_s14 = int_to_ptr.vmem [resolvable:$false] %s3775_s14 }
  0x80   : > { %s3777_s26 = scalar_lea.vmem %s3776_s14, 512  ;;  %p3778_p12 = scmp.lt.s32.totalorder %s4119_s10, %s3776_s14 }
  0x81   : > { %p3773_p5 = pnand %p3771_p3, %p3757_p9  ;;  %p3779_p1 = scmp.lt.s32.totalorder %s3777_s26, %s3770_s17 }
  0x83   : > { %p3774_p7 = pneg %p3773_p5  ;;  %p3780_p2 = por %p3779_p1, %p3778_p12 }
  0x85   : > { %p3781_p13 = pnand %p3780_p2, %p3774_p7 }
  0x87   : > { %3784 = shalt.err (!%p3781_p13)
}
  0x88   : > { %3529 = dma.hbm_to_vmem [thread:$0]  (!%p4121_p11), %s4117_s7, 256, %s4119_s10, %s4125_s8, %s3872_s30, %s3872_s30, %s3873_s9  }
  0x89   : > { %p4466_p9 = scmp.ne.s32.totalorder %s4460_s29, 0 }
  0x8a   : > { %s4159_s13 = sand.u32 (!%p4466_p9), 1, %s3855_s22   ;;  %p4467_p0 = scmp.ne.s32.totalorder (!%p4466_p9), %s4458_s27, 0 }
  0x8b   : > { %277 = sbr.rel (%p4466_p9) target bundleno = 1920 (0x780), region = 44  ;;  %s3234_s20 = sshll.u32 (!%p4466_p9), %s4159_s13, 4 }
  0x8c   : > { %s280_s12 = scalar_lea.sflag (!%p4466_p9), [#allocation3], %s4159_s13  ;;  %s4163_s17 = scalar_lea.vmem (!%p4466_p9), [#allocation2], %s3234_s20 }
  0x92   : > { %3834 = dma.done.wait (%p4467_p0), %s280_s12, 256  }
  0x93   : > { %3836 = vsyncadd (%p4467_p0), %s280_s12, 4294967040  ;;  %p4468_p11 = scmp.eq.s32.totalorder %s3954_s25, 0 }
  0x95   : > { %3838 = dma.done.wait (%p4468_p11), [#allocation6], 1024   ;;  %p4469_p4 = pmov %p4468_p11 }
  0x97   : > { %3840 = vsyncadd (%p4469_p4), [#allocation6], 4294966272  ;;  %p4470_p8 = pmov %p4469_p4 }
  0x98   : > { %p4471_p6 = pmov %p4469_p4 }
  0x99   : > { %3842 = dma.done.wait (%p4470_p8), [#allocation9], 1024  }
  0x9a   : > { %3844 = vsyncadd (%p4471_p6), [#allocation9], 4294966272  ;;  %s4177_s29 = scalar_lea.vmem [#allocation11], %s3234_s20  ;;  %s4179_s30 = smov 0  }
  0x9b LB: >> { %v417_v0 = vld [vmem:[#allocation7] sm:$0xff]  ;;  %v418_v1 = vld [vmem:[#allocation7 + $0x8] sm:$0xff]  ;;  %v419_v2 = vld [vmem:[#allocation7 + $0x10] sm:$0xff]  ;;  %v3876_v3 = vmov 0.0|0.0   ;;  %vm3877_vm0 = vmmov 0   ;;  %v3878_v6 = vmov 0.0   ;;  %s3867_s30 = sphi %s4179_s30, %s335_s30  }
  0x9c   : >> { %3475 = vmatprep.subr.bf16.mxu1 %v3876_v3  ;;  %v3476_v4 = vpack.c.bf16 %v418_v1, %v417_v0  ;;  %v420_v5 = vld [vmem:[#allocation7 + $0x18] sm:$0xff]  ;;  %3364 = vmatprep.mubr.msk.f32.mxu1 %vm3877_vm0, %v3878_v6  ;;  %v339_v7 = vld [vmem:[#allocation5] sm:$0xff]  ;;  %v340_v8 = vld [vmem:[#allocation5 + $0x8] sm:$0xff]  ;;  %s3240_s27 = sshll.u32 %s3867_s30, 3  ;;  %vm343_vm1 = vcmask 261120   ;;  %s3879_s7 = smov 116  }
  0x9d   : >> { %3469 = vmatprep.subr.bf16.mxu0 %v3876_v3  ;;  %v3470_v9 = vpack.c.bf16 %v340_v8, %v339_v7  ;;  %v341_v10 = vld [vmem:[#allocation5 + $0x10] sm:$0xff]  ;;  %v342_v11 = vld [vmem:[#allocation5 + $0x18] sm:$0xff]  ;;  %3353 = vmatprep.mubr.msk.f32.mxu0 %vm3877_vm0, %v3878_v6  ;;  %v3479_v12 = vpack.c.bf16 %v420_v5, %v419_v2  ;;  %s337_s9 = scalar_lea.vmem %s4163_s17, %s3240_s27 [#allocation2]  ;;  %s3880_s10 = smov 124   ;;  %v491_v19 = vld [vmem:[#allocation8] sm:$0xff]  ;;  %vm883_vm2 = vcmask 1043456   ;;  %vm880_vm3 = vcmask 31744  }
  0x9e   : >> { %3477 = vmatpush3.bf16.msra.mxu1 %v3476_v4  ;;  %v3473_v13 = vpack.c.bf16 %v342_v11, %v341_v10  ;;  %v338_v14 = vld [vmem:[%s337_s9] sm:$0xff]  ;;  %s3881_s11 = smov 112   ;;  %s3882_s8 = smov 120   ;;  %v492_v20 = vld [vmem:[#allocation8 + $0x8] sm:$0xff]  ;;  %v493_v21 = vld [vmem:[#allocation8 + $0x10] sm:$0xff]  ;;  %vm1482_vm4 = vcmask 64512  }
  0x9f   : >> { %3478 = vmatprep.subr.bf16.mxu1 %v3876_v3  ;;  %3471 = vmatpush3.bf16.msra.mxu0 %v3470_v9  ;;  %s3883_s19 = smov 104   ;;  %s3884_s14 = smov 108   ;;  %v3482_v22 = vpack.c.bf16 %v492_v20, %v491_v19  ;;  %v494_v23 = vld [vmem:[#allocation8 + $0x18] sm:$0xff]  ;;  %vm2993_vm5 = vcmask 97280   ;;  %vm2995_vm6 = vcmask 130048   ;;  %vm2997_vm7 = vcmask 162816  }
  0xa0   : >> { %3472 = vmatprep.subr.bf16.mxu0 %v3876_v3  ;;  %s3885_s26 = smov 100   ;;  %v3485_v24 = vpack.c.bf16 %v494_v23, %v493_v21  ;;  %s3888_s20 = smov 8   ;;  %vm2999_vm8 = vcmask 195584   ;;  %vm3001_vm9 = vcmask 228352  }
  0xa1   : >> { %s3889_s12 = smov 4   ;;  %s3890_s9 = smov 12  }
  0xa2   : >> { %3480 = vmatpush3.bf16.msra.mxu1 %v3479_v12  ;;  %s335_s30 = sadd.s32 1, %s3867_s30  }
  0xa3   : >> { %3474 = vmatpush3.bf16.msra.mxu0 %v3473_v13  ;;  %3378 = vmatprep.subr.mxu1 %v3878_v6  ;;  %p332_p3 = scmp.ge.s32.totalorder %s335_s30, 2  }
  0xa4   : >> { %3481 = vmatprep.subr.bf16.mxu0 %v3876_v3  ;;  %s3895_s17 = smov (%p332_p3), [#allocation11]  }
  0xa5   : >> { %3365 = vmatmul.mubr.msk.f32.vlgmr.msra.gmra.mrb[0].mxu1 %vm343_vm1, %v338_v14  ;;  %s3789_s30 = sshll.u32 (%p332_p3), %s3895_s17, 4  ;;  %s3790_s30 = int_to_ptr.vmem [resolvable:$false] %s3789_s30 }
  0xa6   : >> { %3354 = vmatmul.mubr.msk.f32.vlgmr.msra.gmra.mrb[0].mxu0 %vm343_vm1, %v338_v14  ;;  %3380 = vmatprep.mubr.msk.f32.mxu1 %vm3877_vm0, %v3878_v6 }
  0xa7   : >> { %3375 = vmatprep.mubr.msk.f32.mxu0 %vm3877_vm0, %v3878_v6  ;;  %3483 = vmatpush3.bf16.msra.mxu0 %v3482_v22 }
  0xa8   : >> { %3484 = vmatprep.subr.bf16.mxu0 %v3876_v3 }
  0xab   : >> { %3486 = vmatpush3.bf16.msra.mxu0 %v3485_v24 }
  0xac   : >> { %3398 = vmatprep.subr.mxu0 %v3878_v6 }
  0xae   : >> { %3376 = vmatmul.mubr.msk.f32.vlgmr.msra.gmra.mrb[2].mxu0 %vm343_vm1, %v338_v14 }
  0xaf   : >> { %3400 = vmatprep.mubr.msk.f32.mxu0 %vm3877_vm0, %v3878_v6 }
 0x178   : >> { %v487_v15 = vpop.f32.mrb[0].mxu1 }
 0x179   : >> { %587 = vrot.lane.b32.xlu1 %v487_v15, %s3879_s7  ;;  %581 = vrot.lane.b32.xlu0 %v487_v15, %s3880_s10  ;;  %v3366_v16 = vpop.f32.mrb[1].mxu1  ;;  %v413_v17 = vpop.f32.mrb[0].mxu0 }
 0x17a   : >> { %v3355_v18 = vpop.f32.mrb[1].mxu0 }
 0x17d   : >> { %590 = vrot.lane.b32.xlu1 %v487_v15, %s3881_s11  ;;  %584 = vrot.lane.b32.xlu0 %v487_v15, %s3882_s8 }
 0x181   : >> { %596 = vrot.lane.b32.xlu1 %v487_v15, %s3883_s19  ;;  %593 = vrot.lane.b32.xlu0 %v487_v15, %s3884_s14  ;;  %v561_v47 = vpop.f32.mrb[2].mxu0 }
 0x182   : >> { %v3377_v48 = vpop.f32.mrb[3].mxu0 }
 0x185   : >> { %599 = vrot.lane.b32.xlu0 %v487_v15, %s3885_s26  ;;  %566 = vrot.lane.b32.xlu1 %v413_v17, %s3880_s10 }
 0x189   : >> { %568 = vrot.lane.b32.xlu0 %v413_v17, %s3882_s8  ;;  %570 = vrot.lane.b32.xlu1 %v413_v17, %s3879_s7 }
 0x18d   : >> { %572 = vrot.lane.b32.xlu0 %v413_v17, %s3881_s11  ;;  %574 = vrot.lane.b32.xlu1 %v413_v17, %s3884_s14 }
 0x191   : >> { %576 = vrot.lane.b32.xlu0 %v413_v17, %s3883_s19  ;;  %578 = vrot.lane.b32.xlu1 %v413_v17, %s3885_s26 }
 0x1af   : >> { %624 = vxpose.xlu0.b32.start.end [1/1] (short) (narrow) %v487_v15, 8 }
 0x1eb   : >> { %v582_v25 = vpop.permute.xlu0 %581  ;;  %v588_v26 = vpop.permute.xlu1 %587 }
 0x1ec   : >> { %656 = vxpose.xlu1.b32.start.end [1/1] (short) (narrow) %v582_v25, 8 }
 0x1ef   : >> { %v585_v27 = vpop.permute.xlu0 %584  ;;  %v591_v29 = vpop.permute.xlu1 %590 }
 0x1f0   : >> { %688 = vxpose.xlu0.b32.start.end [1/1] (short) (narrow) %v585_v27, 8 }
 0x1f3   : >> { %v594_v28 = vpop.permute.xlu0 %593  ;;  %v597_v31 = vpop.permute.xlu1 %596 }
 0x1f4   : >> { %720 = vxpose.xlu0.b32.start.end [1/1] (short) (narrow) %v588_v26, 8  ;;  %784 = vxpose.xlu1.b32.start.end [1/1] (short) (narrow) %v594_v28, 8 }
 0x1f7   : >> { %v600_v30 = vpop.permute.xlu0 %599  ;;  %v567_v36 = vpop.permute.xlu1 %566 }
 0x1f8   : >> { %752 = vxpose.xlu0.b32.start.end [1/1] (short) (narrow) %v591_v29, 8  ;;  %848 = vxpose.xlu1.b32.start.end [1/1] (short) (narrow) %v600_v30, 8 }
 0x1fb   : >> { %v569_v32 = vpop.permute.xlu0 %568  ;;  %v571_v37 = vpop.permute.xlu1 %570 }
 0x1fc   : >> { %816 = vxpose.xlu0.b32.start.end [1/1] (short) (narrow) %v597_v31, 8 }
 0x1ff   : >> { %v573_v33 = vpop.permute.xlu0 %572  ;;  %v575_v38 = vpop.permute.xlu1 %574 }
 0x203   : >> { %v577_v34 = vpop.permute.xlu0 %576  ;;  %v579_v39 = vpop.permute.xlu1 %578 }
 0x216   : >> { %603 = vrot.lane.b32.xlu1 %v561_v47, %s3880_s10  ;;  %s3892_s10 = smov 16  }
 0x22f   : >> { %v640_v35 = vpop.trf.xlu0 }
 0x230   : >> { %3379 = vmatpush3.msk.msra.mxu1 %vm883_vm2, %v640_v35 }
 0x231   : >> { %3381 = vmatmul.mubr.msk.f32.vlgmr.msra.gmra.mrb[2].mxu1 %vm880_vm3, %v413_v17  ;;  %3383 = vmatprep.subr.mxu1 %v3878_v6 }
 0x232   : >> { %3385 = vmatprep.mubr.msk.f32.mxu1 %vm3877_vm0, %v3878_v6 }
 0x26c   : >> { %v672_v40 = vpop.trf.xlu1 }
 0x26d   : >> { %3384 = vmatpush3.msk.msra.mxu1 %vm883_vm2, %v672_v40 }
 0x26e   : >> { %3386 = vmatmul.mubr.msk.f32.vlgmr.msra.gmra.mrb[4].mxu1 %vm880_vm3, %v567_v36  ;;  %3388 = vmatprep.subr.mxu1 %v3878_v6 }
 0x26f   : >> { %3390 = vmatprep.mubr.msk.f32.mxu1 %vm3877_vm0, %v3878_v6 }
 0x270   : >> { %v704_v41 = vpop.trf.xlu0 }
 0x271   : >> { %3389 = vmatpush3.msk.msra.mxu1 %vm883_vm2, %v704_v41 }
 0x272   : >> { %3391 = vmatmul.mubr.msk.f32.vlgmr.msra.gmra.mrb[6].mxu1 %vm880_vm3, %v569_v32  ;;  %3393 = vmatprep.subr.mxu1 %v3878_v6 }
 0x273   : >> { %3395 = vmatprep.mubr.msk.f32.mxu1 %vm3877_vm0, %v3878_v6 }
 0x274   : >> { %v736_v42 = vpop.trf.xlu0  ;;  %v800_v43 = vpop.trf.xlu1 }
 0x275   : >> { %3394 = vmatpush3.msk.msra.mxu1 %vm883_vm2, %v736_v42 }
 0x276   : >> { %3396 = vmatmul.mubr.msk.f32.vlgmr.msra.gmra.mrb[8].mxu1 %vm880_vm3, %v571_v37  ;;  %3403 = vmatprep.subr.mxu1 %v3878_v6 }
 0x277   : >> { %3404 = vmatpush3.msk.msra.mxu1 %vm883_vm2, %v800_v43  ;;  %3405 = vmatprep.mubr.msk.f32.mxu1 %vm3877_vm0, %v3878_v6 }
 0x278   : >> { %v768_v44 = vpop.trf.xlu0  ;;  %3413 = vmatprep.subr.mxu1 %v3878_v6  ;;  %v864_v45 = vpop.trf.xlu1 }
 0x279   : >> { %3399 = vmatpush3.msk.msra.mxu0 %vm883_vm2, %v768_v44 }
 0x27a   : >> { %3401 = vmatmul.mubr.msk.f32.vlgmr.msra.gmra.mrb[4].mxu0 %vm880_vm3, %v573_v33  ;;  %3406 = vmatmul.mubr.msk.f32.vlgmr.msra.gmra.mrb[10].mxu1 %vm880_vm3, %v575_v38 }
 0x27b   : >> { %3408 = vmatprep.subr.mxu0 %v3878_v6  ;;  %3410 = vmatprep.mubr.msk.f32.mxu0 %vm3877_vm0, %v3878_v6 }
 0x27c   : >> { %v832_v46 = vpop.trf.xlu0  ;;  %3414 = vmatpush3.msk.msra.mxu1 %vm883_vm2, %v864_v45  ;;  %3415 = vmatprep.mubr.msk.f32.mxu1 %vm3877_vm0, %v3878_v6 }
 0x27d   : >> { %3409 = vmatpush3.msk.msra.mxu0 %vm883_vm2, %v832_v46  ;;  %3423 = vmatprep.subr.mxu1 %v3878_v6 }
 0x27e   : >> { %3411 = vmatmul.mubr.msk.f32.vlgmr.msra.gmra.mrb[6].mxu0 %vm880_vm3, %v577_v34  ;;  %3416 = vmatmul.mubr.msk.f32.vlgmr.msra.gmra.mrb[12].mxu1 %vm880_vm3, %v579_v39 }
 0x27f   : >> { %3418 = vmatprep.subr.mxu0 %v3878_v6  ;;  %3420 = vmatprep.mubr.msk.f32.mxu0 %vm3877_vm0, %v3878_v6 }
 0x280   : >> { %3425 = vmatprep.mubr.msk.f32.mxu1 %vm3877_vm0, %v3878_v6 }
 0x288   : >> { %v604_v11 = vpop.permute.xlu1 %603 }
 0x304   : >> { %v953_v49 = vpop.f32.mrb[2].mxu1 }
 0x305   : >> { %v3382_v50 = vpop.f32.mrb[3].mxu1  ;;  %v1483_v51 = vsel %vm1482_vm4, %v953_v49, -inf }
 0x306   : >> { %1484 = vmax.xlane.f32.xlu0 %v1483_v51 }
 0x341   : >> { %v1028_v52 = vpop.f32.mrb[4].mxu1 }
 0x342   : >> { %v3387_v53 = vpop.f32.mrb[5].mxu1  ;;  %v1486_v54 = vsel %vm1482_vm4, %v1028_v52, -inf }
 0x343   : >> { %1487 = vmax.xlane.f32.xlu1 %v1486_v54 }
 0x345   : >> { %v1103_v55 = vpop.f32.mrb[6].mxu1 }
 0x346   : >> { %v3392_v56 = vpop.f32.mrb[7].mxu1  ;;  %v1489_v9 = vsel %vm1482_vm4, %v1103_v55, -inf }
 0x349   : >> { %v1178_v57 = vpop.f32.mrb[8].mxu1 }
 0x34a   : >> { %v3397_v58 = vpop.f32.mrb[9].mxu1  ;;  %v1492_v59 = vsel %vm1482_vm4, %v1178_v57, -inf }
 0x34b   : >> { %1493 = vmax.xlane.f32.xlu0 %v1492_v59 }
 0x34d   : >> { %v1253_v60 = vpop.f32.mrb[4].mxu0  ;;  %v1328_v61 = vpop.f32.mrb[10].mxu1 }
 0x34e   : >> { %v3402_v62 = vpop.f32.mrb[5].mxu0  ;;  %v3407_v63 = vpop.f32.mrb[11].mxu1  ;;  %v1498_v0 = vsel %vm1482_vm4, %v1328_v61, -inf  ;;  %v1495_v1 = vsel %vm1482_vm4, %v1253_v60, -inf }
 0x34f   : >> { %1499 = vmax.xlane.f32.xlu0 %v1498_v0  ;;  %1496 = vmax.xlane.f32.xlu1 %v1495_v1 }
 0x351   : >> { %v1403_v2 = vpop.f32.mrb[6].mxu0  ;;  %v1478_v4 = vpop.f32.mrb[12].mxu1 }
 0x352   : >> { %v3412_v5 = vpop.f32.mrb[7].mxu0  ;;  %v3417_v7 = vpop.f32.mrb[13].mxu1  ;;  %v1504_v8 = vsel %vm1482_vm4, %v1478_v4, -inf  ;;  %v1501_v10 = vsel %vm1482_vm4, %v1403_v2, -inf }
 0x353   : >> { %1505 = vmax.xlane.f32.xlu0 %v1504_v8  ;;  %1490 = vmax.xlane.f32.xlu1 %v1489_v9 }
 0x357   : >> { %1502 = vmax.xlane.f32.xlu1 %v1501_v10 }
 0x380   : >> { %1571 = vxpose.xlu0.b32.start.end [1/1] (short) (narrow) %v561_v47, 8 }
 0x38a   : >> { %1603 = vxpose.xlu1.b32.start.end [1/1] (short) (narrow) %v604_v11, 8 }
 0x393   : >> { %v1485_v12 = vpop.xlane.xlu0 %1484 }
 0x394   : >> { %v1507_v13 = vsub.f32 %v953_v49, %v1485_v12 }
 0x396   : >> { %v1515_v14 = vmul.f32 1.442695, %v1507_v13 }
 0x398   : >> { %3611 = vpow2.f32 %v1515_v14 }
 0x3a2   : >> { %v4278_v15 = vpop.eup %3611 }
 0x3a3   : >> { %v1531_v19 = vsel %vm1482_vm4, %v4278_v15, 0.0 }
 0x3a8   : >> { %609 = vrot.lane.b32.xlu1 %v561_v47, %s3879_s7  ;;  %s3891_s7 = smov 24  }
 0x3a9   : >> { %606 = vrot.lane.b32.xlu0 %v561_v47, %s3882_s8  ;;  %s3894_s8 = smov 28  }
 0x3ac   : >> { %615 = vrot.lane.b32.xlu1 %v561_v47, %s3884_s14 }
 0x3ad   : >> { %612 = vrot.lane.b32.xlu0 %v561_v47, %s3881_s11  ;;  %s3893_s11 = smov 20  }
 0x3b0   : >> { %621 = vrot.lane.b32.xlu1 %v561_v47, %s3885_s26  ;;  %s3087_s26 = scalar_lea.vmem %s4177_s29, %s3240_s27 [#allocation11] }
 0x3b1   : >> { %618 = vrot.lane.b32.xlu0 %v561_v47, %s3883_s19 }
 0x3d0   : >> { %v1488_v16 = vpop.xlane.xlu1 %1487 }
 0x3d1   : >> { %v1508_v17 = vsub.f32 %v1028_v52, %v1488_v16 }
 0x3d3   : >> { %v1517_v18 = vmul.f32 1.442695, %v1508_v17 }
 0x3d4   : >> { %1532 = vadd.xlane.f32.xlu1 %v1531_v19 }
 0x3d5   : >> { %3613 = vpow2.f32 %v1517_v18 }
 0x3d8   : >> { %v1494_v20 = vpop.xlane.xlu0 %1493 }
 0x3d9   : >> { %v1510_v29 = vsub.f32 %v1178_v57, %v1494_v20 }
 0x3db   : >> { %v1521_v35 = vmul.f32 1.442695, %v1510_v29 }
 0x3dc   : >> { %v1500_v21 = vpop.xlane.xlu0 %1499  ;;  %v1497_v22 = vpop.xlane.xlu1 %1496 }
 0x3dd   : >> { %v1511_v24 = vsub.f32 %v1253_v60, %v1497_v22  ;;  %v1512_v36 = vsub.f32 %v1328_v61, %v1500_v21 }
 0x3df   : >> { %v4282_v23 = vpop.eup %3613  ;;  %v1523_v31 = vmul.f32 1.442695, %v1511_v24  ;;  %v1525_v39 = vmul.f32 1.442695, %v1512_v36 }
 0x3e0   : >> { %v1491_v25 = vpop.xlane.xlu1 %1490  ;;  %v1534_v26 = vsel %vm1482_vm4, %v4282_v23, 0.0  ;;  %v1506_v27 = vpop.xlane.xlu0 %1505 }
 0x3e1   : >> { %v1509_v28 = vsub.f32 %v1103_v55, %v1491_v25  ;;  %1535 = vadd.xlane.f32.xlu0 %v1534_v26  ;;  %v1514_v32 = vsub.f32 %v1478_v4, %v1506_v27 }
 0x3e3   : >> { %v1519_v30 = vmul.f32 1.442695, %v1509_v28  ;;  %v1529_v38 = vmul.f32 1.442695, %v1514_v32 }
 0x3e4   : >> { %v1503_v33 = vpop.xlane.xlu1 %1502 }
 0x3e5   : >> { %v1513_v34 = vsub.f32 %v1403_v2, %v1503_v33  ;;  %3615 = vpow2.f32 %v1519_v30 }
 0x3e6   : >> { %3617 = vpow2.f32 %v1523_v31 }
 0x3e7   : >> { %v1527_v37 = vmul.f32 1.442695, %v1513_v34 }
 0x3e9   : >> { %3619 = vpow2.f32 %v1527_v37 }
 0x3ea   : >> { %3621 = vpow2.f32 %v1521_v35 }
 0x3eb   : >> { %3623 = vpow2.f32 %v1529_v38 }
 0x3ec   : >> { %3625 = vpow2.f32 %v1525_v39 }
 0x3ef   : >> { %v3616_v40 = vpop.eup %3615 }
 0x3f0   : >> { %v1537_v41 = vsel %vm1482_vm4, %v3616_v40, 0.0  ;;  %v4287_v42 = vpop.eup %3617 }
 0x3f1   : >> { %1538 = vadd.xlane.f32.xlu1 %v1537_v41  ;;  %v1543_v46 = vsel %vm1482_vm4, %v4287_v42, 0.0 }
 0x3f3   : >> { %v4289_v43 = vpop.eup %3619 }
 0x3f4   : >> { %v1549_v44 = vsel %vm1482_vm4, %v4289_v43, 0.0  ;;  %v3622_v45 = vpop.eup %3621 }
 0x3f5   : >> { %1550 = vadd.xlane.f32.xlu0 %v1549_v44  ;;  %v4295_v47 = vpop.eup %3623  ;;  %1544 = vadd.xlane.f32.xlu1 %v1543_v46  ;;  %v1540_v48 = vsel %vm1482_vm4, %v3622_v45, 0.0  ;;  %v3886_v44 = vmov 1983009808   ;;  %v2696_v46 = vlaneseq }
 0x3f6   : >> { %v4298_v49 = vpop.eup %3625  ;;  %v1552_v50 = vsel %vm1482_vm4, %v4295_v47, 0.0 }
 0x3f7   : >> { %v1546_v51 = vsel %vm1482_vm4, %v4298_v49, 0.0 }
 0x3f9   : >> { %1541 = vadd.xlane.f32.xlu0 %v1540_v48  ;;  %1553 = vadd.xlane.f32.xlu1 %v1552_v50  ;;  %v3887_v48 = vmov 1934713408  }
 0x3fd   : >> { %1547 = vadd.xlane.f32.xlu0 %v1546_v51  ;;  %v2697_v51 = vshrl.u32 %v2696_v46, 7  ;;  %v3003_v46 = vld [vmem:[#allocation10] sm:$0xff] }
 0x400   : >> { %v1587_v52 = vpop.trf.xlu0 }
 0x40a   : >> { %v1619_v53 = vpop.trf.xlu1 }
 0x41a   : >> { %v610_v55 = vpop.permute.xlu1 %609 }
 0x41b   : >> { %v607_v54 = vpop.permute.xlu0 %606 }
 0x41e   : >> { %v616_v57 = vpop.permute.xlu1 %615 }
 0x41f   : >> { %v613_v56 = vpop.permute.xlu0 %612 }
 0x422   : >> { %v622_v59 = vpop.permute.xlu1 %621 }
 0x423   : >> { %v619_v58 = vpop.permute.xlu0 %618 }
 0x42a   : >> { %1635 = vxpose.xlu0.b32.start.end [1/1] (short) (narrow) %v607_v54, 8 }
 0x42c   : >> { %1699 = vxpose.xlu1.b32.start.end [1/1] (short) (narrow) %v613_v56, 8 }
 0x42e   : >> { %1667 = vxpose.xlu0.b32.start.end [1/1] (short) (narrow) %v610_v55, 8 }
 0x430   : >> { %1763 = vxpose.xlu1.b32.start.end [1/1] (short) (narrow) %v619_v58, 8 }
 0x432   : >> { %1731 = vxpose.xlu0.b32.start.end [1/1] (short) (narrow) %v616_v57, 8 }
 0x436   : >> { %1795 = vxpose.xlu0.b32.start.end [1/1] (short) (narrow) %v622_v59, 8 }
 0x461   : >> { %v1533_v60 = vpop.xlane.xlu1 %1532 }
 0x462   : >> { %3627 = vrcp.f32 %v1533_v60 }
 0x46c   : >> { %v3628_v61 = vpop.eup %3627 }
 0x46d   : >> { %v1556_v62 = vmul.f32 %v3628_v61, %v4278_v15 }
 0x46e   : >> { %v1536_v63 = vpop.xlane.xlu0 %1535 }
 0x46f   : >> { %3629 = vrcp.f32 %v1536_v63  ;;  %3419 = vmatpush3.xpose.msk.msra.mxu0 %vm1482_vm4, %v1556_v62 }
 0x470   : >> { %3428 = vmatprep.subr.mxu0 %v3878_v6 }
 0x472   : >> { %3421 = vmatmul.mubr.msk.f32.vlgmr.msra.gmra.mrb[8].mxu0 %vm1482_vm4, %v1587_v52 }
 0x473   : >> { %3430 = vmatprep.mubr.msk.f32.mxu0 %vm3877_vm0, %v3878_v6 }
 0x479   : >> { %v3630_v0 = vpop.eup %3629 }
 0x47a   : >> { %v1558_v1 = vmul.f32 %v3630_v0, %v4282_v23 }
 0x47c   : >> { %3424 = vmatpush3.xpose.msk.msra.mxu1 %vm1482_vm4, %v1558_v1 }
 0x47d   : >> { %3433 = vmatprep.subr.mxu1 %v3878_v6 }
 0x47e   : >> { %v1539_v2 = vpop.xlane.xlu1 %1538 }
 0x47f   : >> { %3426 = vmatmul.mubr.msk.f32.vlgmr.msra.gmra.mrb[14].mxu1 %vm1482_vm4, %v1619_v53  ;;  %3631 = vrcp.f32 %v1539_v2 }
 0x480   : >> { %3435 = vmatprep.mubr.msk.f32.mxu1 %vm3877_vm0, %v3878_v6 }
 0x482   : >> { %v1551_v4 = vpop.xlane.xlu0 %1550  ;;  %v1545_v11 = vpop.xlane.xlu1 %1544 }
 0x486   : >> { %v1542_v5 = vpop.xlane.xlu0 %1541  ;;  %v1554_v13 = vpop.xlane.xlu1 %1553 }
 0x487   : >> { %3633 = vrcp.f32 %v1542_v5 }
 0x488   : >> { %3635 = vrcp.f32 %v1545_v11 }
 0x489   : >> { %v3632_v7 = vpop.eup %3631  ;;  %3637 = vrcp.f32 %v1551_v4 }
 0x48a   : >> { %v1560_v8 = vmul.f32 %v3632_v7, %v3616_v40  ;;  %v1548_v12 = vpop.xlane.xlu0 %1547 }
 0x48b   : >> { %3639 = vrcp.f32 %v1548_v12 }
 0x48c   : >> { %3429 = vmatpush3.xpose.msk.msra.mxu0 %vm1482_vm4, %v1560_v8  ;;  %3641 = vrcp.f32 %v1554_v13 }
 0x48d   : >> { %3438 = vmatprep.subr.mxu0 %v3878_v6 }
 0x491   : >> { %v3634_v9 = vpop.eup %3633 }
 0x492   : >> { %v1562_v10 = vmul.f32 %v3634_v9, %v3622_v45  ;;  %v3636_v14 = vpop.eup %3635  ;;  %v2694_v45 = vunpack.c.l.s4 %v3886_v44 }
 0x493   : >> { %v3638_v15 = vpop.eup %3637  ;;  %v1564_v16 = vmul.f32 %v3636_v14, %v4287_v42 }
 0x494   : >> { %3434 = vmatpush3.xpose.msk.msra.mxu1 %vm1482_vm4, %v1562_v10  ;;  %v1568_v20 = vmul.f32 %v3638_v15, %v4289_v43  ;;  %v2695_v50 = vunpack.c.0.s8 %v2694_v45 }
 0x495   : >> { %3443 = vmatprep.subr.mxu1 %v3878_v6  ;;  %v3640_v18 = vpop.eup %3639 }
 0x496   : >> { %v1566_v21 = vmul.f32 %v3640_v18, %v4298_v49  ;;  %v3642_v23 = vpop.eup %3641  ;;  %v2758_v49 = vunpack.c.l.s4 %v3887_v48  ;;  %v4347_v54 = vsub.s32 %v2695_v50, %v2697_v51 }
 0x497   : >> { %v1570_v25 = vmul.f32 %v3642_v23, %v4295_v47 }
 0x498   : >> { %v2759_v53 = vunpack.c.0.s8 %v2758_v49 }
 0x49a   : >> { %v4349_v61 = vsub.s32 %v2759_v53, %v2697_v51 }
 0x4aa   : >> { %v1651_v17 = vpop.trf.xlu0 }
 0x4ab   : >> { %3431 = vmatmul.mubr.msk.f32.vlgmr.msra.gmra.mrb[10].mxu0 %vm1482_vm4, %v1651_v17 }
 0x4ac   : >> { %3439 = vmatpush3.xpose.msk.msra.mxu0 %vm1482_vm4, %v1564_v16  ;;  %3440 = vmatprep.mubr.msk.f32.mxu0 %vm3877_vm0, %v3878_v6  ;;  %v1715_v19 = vpop.trf.xlu1 }
 0x4ad   : >> { %3448 = vmatprep.subr.mxu0 %v3878_v6 }
 0x4ae   : >> { %v1683_v22 = vpop.trf.xlu0 }
 0x4af   : >> { %3436 = vmatmul.mubr.msk.f32.vlgmr.msra.gmra.mrb[16].mxu1 %vm1482_vm4, %v1683_v22  ;;  %3441 = vmatmul.mubr.msk.f32.vlgmr.msra.gmra.mrb[12].mxu0 %vm1482_vm4, %v1715_v19 }
 0x4b0   : >> { %3444 = vmatpush3.xpose.msk.msra.mxu1 %vm1482_vm4, %v1566_v21  ;;  %3449 = vmatpush3.xpose.msk.msra.mxu0 %vm1482_vm4, %v1568_v20  ;;  %v1779_v24 = vpop.trf.xlu1 }
 0x4b1   : >> { %3445 = vmatprep.mubr.msk.f32.mxu1 %vm3877_vm0, %v3878_v6  ;;  %3453 = vmatprep.subr.mxu1 %v3878_v6 }
 0x4b2   : >> { %v1747_v26 = vpop.trf.xlu0  ;;  %3450 = vmatprep.mubr.msk.f32.mxu0 %vm3877_vm0, %v3878_v6  ;;  %3487 = vmatprep.subr.bf16.mxu0 %v3876_v3 }
 0x4b3   : >> { %3446 = vmatmul.mubr.msk.f32.vlgmr.msra.gmra.mrb[18].mxu1 %vm1482_vm4, %v1747_v26  ;;  %3451 = vmatmul.mubr.msk.f32.vlgmr.msra.gmra.mrb[14].mxu0 %vm1482_vm4, %v1779_v24 }
 0x4b4   : >> { %3454 = vmatpush3.xpose.msk.msra.mxu1 %vm1482_vm4, %v1570_v25  ;;  %3455 = vmatprep.mubr.msk.f32.mxu1 %vm3877_vm0, %v3878_v6 }
 0x4b5   : >> { %3466 = vmatprep.mubr.msk.f32.mxu0 %vm3877_vm0, %v3878_v6 }
 0x4b6   : >> { %v1811_v27 = vpop.trf.xlu0 }
 0x4b7   : >> { %3456 = vmatmul.mubr.msk.f32.vlgmr.msra.gmra.mrb[20].mxu1 %vm1482_vm4, %v1811_v27 }
 0x545   : >> { %v1899_v28 = vpop.f32.mrb[8].mxu0 }
 0x546   : >> { %2435 = vxpose.xlu1.b32.start.end [1/1] (short) (narrow) %v1899_v28, 8  ;;  %v3422_v29 = vpop.f32.mrb[9].mxu0 }
 0x552   : >> { %v1975_v30 = vpop.f32.mrb[14].mxu1 }
 0x553   : >> { %v3427_v31 = vpop.f32.mrb[15].mxu1  ;;  %2467 = vxpose.xlu0.b32.start.end [1/1] (short) (narrow) %v1975_v30, 8 }
 0x57e   : >> { %v2051_v32 = vpop.f32.mrb[10].mxu0 }
 0x57f   : >> { %v3432_v33 = vpop.f32.mrb[11].mxu0  ;;  %2499 = vxpose.xlu1.b32.start.end [1/1] (short) (narrow) %v2051_v32, 8 }
 0x582   : >> { %v2127_v34 = vpop.f32.mrb[16].mxu1  ;;  %v2203_v35 = vpop.f32.mrb[12].mxu0 }
 0x583   : >> { %2531 = vxpose.xlu0.b32.start.end [1/1] (short) (narrow) %v2127_v34, 8  ;;  %v3437_v36 = vpop.f32.mrb[17].mxu1  ;;  %2563 = vxpose.xlu1.b32.start.end [1/1] (short) (narrow) %v2203_v35, 8  ;;  %v3442_v37 = vpop.f32.mrb[13].mxu0 }
 0x586   : >> { %v2279_v38 = vpop.f32.mrb[18].mxu1  ;;  %v2355_v6 = vpop.f32.mrb[14].mxu0 }
 0x587   : >> { %2595 = vxpose.xlu0.b32.start.end [1/1] (short) (narrow) %v2279_v38, 8  ;;  %v3447_v39 = vpop.f32.mrb[19].mxu1  ;;  %2627 = vxpose.xlu1.b32.start.end [1/1] (short) (narrow) %v2355_v6, 8  ;;  %v3452_v40 = vpop.f32.mrb[15].mxu0 }
 0x58a   : >> { %v2431_v41 = vpop.f32.mrb[20].mxu1 }
 0x58b   : >> { %2659 = vxpose.xlu0.b32.start.end [1/1] (short) (narrow) %v2431_v41, 8  ;;  %v3457_v42 = vpop.f32.mrb[21].mxu1 }
 0x5c6   : >> { %v2451_v43 = vpop.trf.xlu1 }
 0x5d3   : >> { %v2483_v47 = vpop.trf.xlu0 }
 0x5ff   : >> { %v2515_v52 = vpop.trf.xlu1 }
 0x600   : >> { %v2691_v55 = vcombine.low %v2451_v43, %v2515_v52  ;;  %v2692_v56 = vcombine.high %v2451_v43, %v2515_v52 }
 0x602   : >> { %v2699_v62 = vrot.slane %v2691_v55, %v4347_v54  ;;  %v2706_v63 = vrot.slane %v2692_v56, %v4347_v54  ;;  %v3005_v56 = vld [vmem:[#allocation10 + $0x10] sm:$0xff] }
 0x603   : >> { %v2547_v57 = vpop.trf.xlu0  ;;  %v2579_v58 = vpop.trf.xlu1 }
 0x604   : >> { %v2707_v59 = vcombine.low %v2483_v47, %v2547_v57  ;;  %v2708_v60 = vcombine.high %v2483_v47, %v2547_v57  ;;  %v3004_v47 = vld [vmem:[#allocation10 + $0x8] sm:$0xff]  ;;  %v3006_v57 = vld [vmem:[#allocation10 + $0x18] sm:$0xff] }
 0x606   : >> { %v2715_v0 = vrot.slane %v2707_v59, %v4347_v54  ;;  %v2722_v1 = vrot.slane %v2708_v60, %v4347_v54 }
 0x607   : >> { %v2611_v2 = vpop.trf.xlu0  ;;  %v2643_v9 = vpop.trf.xlu1 }
 0x608   : >> { %v2755_v4 = vcombine.low %v2699_v62, %v2715_v0  ;;  %v2756_v5 = vcombine.high %v2699_v62, %v2715_v0  ;;  %v2771_v7 = vcombine.low %v2706_v63, %v2722_v1  ;;  %v2772_v8 = vcombine.high %v2706_v63, %v2722_v1 }
 0x609   : >> { %v2723_v14 = vcombine.low %v2579_v58, %v2643_v9  ;;  %v2724_v15 = vcombine.high %v2579_v58, %v2643_v9  ;;  %v3488_v58 = vpack.c.bf16 %v3004_v47, %v3003_v46  ;;  %v3491_v1 = vpack.c.bf16 %v3006_v57, %v3005_v56 }
 0x60a   : >> { %v2763_v10 = vrot.slane %v2755_v4, %v4349_v61  ;;  %v2770_v11 = vrot.slane %v2756_v5, %v4349_v61  ;;  %v2779_v12 = vrot.slane %v2771_v7, %v4349_v61  ;;  %v2786_v13 = vrot.slane %v2772_v8, %v4349_v61 }
 0x60b   : >> { %v2675_v16 = vpop.trf.xlu0  ;;  %v2731_v27 = vrot.slane %v2723_v14, %v4347_v54  ;;  %v2738_v28 = vrot.slane %v2724_v15, %v4347_v54  ;;  %3489 = vmatpush3.bf16.msra.mxu0 %v3488_v58 }
 0x60c   : >> { %v3276_v17 = vcombine.low %v2763_v10, %v2770_v11  ;;  %v3278_v18 = vcombine.high %v2763_v10, %v2770_v11  ;;  %v3280_v19 = vcombine.low %v2779_v12, %v2786_v13  ;;  %v3282_v20 = vcombine.high %v2779_v12, %v2786_v13  ;;  %3490 = vmatprep.subr.bf16.mxu0 %v3876_v3 }
 0x60d   : >> { %v2739_v21 = vcombine.low %v2611_v2, %v2675_v16  ;;  %v2740_v22 = vcombine.high %v2611_v2, %v2675_v16 }
 0x60e   : >> { %v2835_v23 = vrot.slane %v3276_v17, %v4347_v54  ;;  %v2851_v24 = vrot.slane %v3278_v18, %v4347_v54  ;;  %v2867_v25 = vrot.slane %v3280_v19, %v4347_v54  ;;  %v2883_v26 = vrot.slane %v3282_v20, %v4347_v54 }
 0x60f   : >> { %v2747_v29 = vrot.slane %v2739_v21, %v4347_v54  ;;  %v2754_v30 = vrot.slane %v2740_v22, %v4347_v54  ;;  %3492 = vmatpush3.bf16.msra.mxu0 %v3491_v1 }
 0x610   : >> { %v2892_v31 = vcombine.high %v2835_v23, %v2851_v24  ;;  %v2924_v32 = vcombine.high %v2867_v25, %v2883_v26  ;;  %v2891_v33 = vcombine.low %v2835_v23, %v2851_v24  ;;  %v2923_v34 = vcombine.low %v2867_v25, %v2883_v26 }
 0x611   : >> { %v2787_v35 = vcombine.low %v2731_v27, %v2747_v29  ;;  %v2788_v36 = vcombine.high %v2731_v27, %v2747_v29  ;;  %v2803_v37 = vcombine.low %v2738_v28, %v2754_v30  ;;  %v2804_v38 = vcombine.high %v2738_v28, %v2754_v30  ;;  %v3284_v27 = vld [vmem:[%s4453_s5] ss:$0 sm:$0xff] }
 0x612   : >> { %v2906_v6 = vrot.slane %v2892_v31, %v4349_v61  ;;  %v2938_v39 = vrot.slane %v2924_v32, %v4349_v61  ;;  %v2899_v40 = vrot.slane %v2891_v33, %v4349_v61  ;;  %v2931_v41 = vrot.slane %v2923_v34, %v4349_v61 }
 0x613   : >> { %v2795_v42 = vrot.slane %v2787_v35, %v4349_v61  ;;  %v2802_v43 = vrot.slane %v2788_v36, %v4349_v61  ;;  %v2811_v44 = vrot.slane %v2803_v37, %v4349_v61  ;;  %v2818_v45 = vrot.slane %v2804_v38, %v4349_v61 }
 0x614   : >> { %v2957_v48 = vcombine.low %v2906_v6, %v2938_v39  ;;  %v2956_v49 = vcombine.high %v2899_v40, %v2931_v41  ;;  %v2955_v50 = vcombine.low %v2899_v40, %v2931_v41  ;;  %v2958_v0 = vcombine.high %v2906_v6, %v2938_v39 }
 0x615   : >> { %v3277_v51 = vcombine.low %v2795_v42, %v2802_v43  ;;  %v3279_v52 = vcombine.high %v2795_v42, %v2802_v43  ;;  %v3281_v53 = vcombine.low %v2811_v44, %v2818_v45  ;;  %v3283_v55 = vcombine.high %v2811_v44, %v2818_v45 }
 0x616   : >> { %2968 = vrot.lane.b32.xlu0 %v2957_v48, %s3888_s20  ;;  %2964 = vrot.lane.b32.xlu1 %v2956_v49, %s3889_s12  ;;  %s3292_s20 = sshll.u32 (%p332_p3), %s3954_s25, 8  ;;  %s3791_s25 = scalar_lea.vmem (%p332_p3), %s3790_s30, 512 }
 0x617   : >> { %v2842_v59 = vrot.slane %v3277_v51, %v4347_v54  ;;  %v2858_v60 = vrot.slane %v3279_v52, %v4347_v54  ;;  %v2874_v62 = vrot.slane %v3281_v53, %v4347_v54  ;;  %v2890_v63 = vrot.slane %v3283_v55, %v4347_v54  ;;  %s4401_s27 = scalar_lea.hbm (%p332_p3), %s4454_s6, %s3292_s20 }
 0x619   : >> { %v2908_v2 = vcombine.high %v2842_v59, %v2858_v60  ;;  %v2940_v4 = vcombine.high %v2874_v62, %v2890_v63  ;;  %v2907_v5 = vcombine.low %v2842_v59, %v2858_v60  ;;  %v2939_v7 = vcombine.low %v2874_v62, %v2890_v63 }
 0x61a   : >> { %2972 = vrot.lane.b32.xlu1 %v2958_v0, %s3890_s9 }
 0x61b   : >> { %v2922_v8 = vrot.slane %v2908_v2, %v4349_v61  ;;  %v2954_v9 = vrot.slane %v2940_v4, %v4349_v61  ;;  %v2915_v10 = vrot.slane %v2907_v5, %v4349_v61  ;;  %v2947_v11 = vrot.slane %v2939_v7, %v4349_v61 }
 0x61d   : >> { %v2961_v54 = vcombine.low %v2922_v8, %v2954_v9  ;;  %v2959_v12 = vcombine.low %v2915_v10, %v2947_v11  ;;  %v2960_v13 = vcombine.high %v2915_v10, %v2947_v11  ;;  %v2962_v3 = vcombine.high %v2922_v8, %v2954_v9 }
 0x61f   : >> { %2984 = vrot.lane.b32.xlu0 %v2961_v54, %s3891_s7  ;;  %2976 = vrot.lane.b32.xlu1 %v2959_v12, %s3892_s10  ;;  %s3103_s7 = sshll.u32 (%p332_p3), %s4177_s29, 4  ;;  %s3090_s10 = scalar_lea.sflag (%p332_p3), [#allocation4], %s4159_s13  ;;  %s4404_s7 = int_to_ptr.vmem [resolvable:$true] %s3103_s7 }
 0x620   : > { %p3792_p1 = scmp.lt.s32.totalorder (%p332_p3), %s4404_s7, %s3790_s30 }
 0x623   : >> { %2980 = vrot.lane.b32.xlu1 %v2960_v13, %s3893_s11  ;;  %s3785_s11 = scalar_lea.vmem (%p332_p3), %s4404_s7, 256 }
 0x624   : > { %p3786_p5 = scmp.ne.s32.totalorder (%p332_p3), %s4404_s7, %s3785_s11  ;;  %p3793_p2 = scmp.lt.s32.totalorder (%p332_p3), %s3791_s25, %s3785_s11 }
 0x626   : > { %p3787_p7 = pnand (%p332_p3), %p3786_p5, %p4104_p10  ;;  %p3794_p13 = por (%p332_p3), %p3793_p2, %p3792_p1 }
 0x627   : >> { %2988 = vrot.lane.b32.xlu1 %v2962_v3, %s3894_s8 }
 0x628   : > { %p3788_p12 = pneg (%p332_p3), %p3787_p7 }
 0x62a   : > { %p3795_p9 = pnand (%p332_p3), %p3794_p13, %p3788_p12 }
 0x688   : >> { %v2965_v14 = vpop.permute.xlu1 %2964  ;;  %v2969_v16 = vpop.permute.xlu0 %2968 }
 0x689   : >> { %v2991_v17 = vsel %vm880_vm3, %v2955_v50, %v2965_v14 }
 0x68a   : >> { %v2992_v18 = vsel %vm1482_vm4, %v2991_v17, %v2969_v16 }
 0x68c   : >> { %v2973_v15 = vpop.permute.xlu1 %2972 }
 0x68d   : >> { %v2994_v19 = vsel %vm2993_vm5, %v2992_v18, %v2973_v15 }
 0x691   : >> { %v2977_v61 = vpop.permute.xlu1 %2976  ;;  %v2985_v23 = vpop.permute.xlu0 %2984 }
 0x692   : >> { %v2996_v20 = vsel %vm2995_vm6, %v2994_v19, %v2977_v61 }
 0x695   : >> { %v2981_v21 = vpop.permute.xlu1 %2980 }
 0x696   : >> { %v2998_v22 = vsel %vm2997_vm7, %v2996_v20, %v2981_v21 }
 0x697   : >> { %v3000_v24 = vsel %vm2999_vm8, %v2998_v22, %v2985_v23 }
 0x699   : >> { %v2989_v25 = vpop.permute.xlu1 %2988 }
 0x69a   : >> { %v3002_v26 = vsel %vm3001_vm9, %v3000_v24, %v2989_v25 }
 0x69b   : >> { %3467 = vmatmul.mubr.msk.f32.vlgmr.msra.gmra.mrb[16].mxu0 %vm343_vm1, %v3002_v26 }
 0x76b   : > { %334 = sbr.rel (!%p332_p3) target bundleno = 155 (0x9b), region = 114 }
 0x76e   : >> { %v3083_v28 = vpop.f32.mrb[16].mxu0 }
 0x76f   : >> { %v3084_v29 = vadd.f32 %v3284_v27, %v3083_v28  ;;  %v3468_v30 = vpop.f32.mrb[17].mxu0 }
 0x771   : >> { %3088 = vst.msk [vmem:[%s3087_s26] sm:$0xff] %vm343_vm1, %v3084_v29 }
 0x772   : > { %3798 = shalt.err (!%p3795_p9)
}
 0x773   : > { %s3799_s29 = scalar_lea.hbm %s4401_s27, 256  ;;  %s3803_s14 = scalar_lea.hbm %s4454_s6, 512 }
 0x774   : > { %p3800_p0 = scmp.ne.s32.totalorder %s4401_s27, %s3799_s29  ;;  %p3804_p8 = scmp.lt.u32.totalorder %s4401_s27, %s4454_s6 }
 0x775   : > { %p3805_p6 = scmp.lt.u32.totalorder %s3803_s14, %s3799_s29  ;;  %p3807_p5 = scmp.lt.u32.totalorder %s3799_s29, %s4401_s27 }
 0x776   : > { %p3801_p11 = pnand %p3800_p0, %p4104_p10 }
 0x777   : > { %p3806_p3 = por %p3805_p6, %p3804_p8 }
 0x778   : > { %p3802_p4 = pneg %p3801_p11 }
 0x779   : > { %p3808_p7 = por %p3807_p5, %p3806_p3 }
 0x77b   : > { %p3809_p12 = pnand %p3808_p7, %p3802_p4 }
 0x77d   : > { %3812 = shalt.err (!%p3809_p12)
}
 0x77e   : > { %s3896_s12 = smov 128   ;;  %s3897_s9 = smov 8  }
 0x77f   : > { %3511 = dma.vmem_to_hbm [thread:$0]  (%p4104_p10), %s4404_s7, 256, %s4401_s27, %s3090_s10, %s3896_s12, %s3896_s12, %s3897_s9  }
 0x780 PF: > { %s3118_s11 = sand.u32 1, %s3851_s21   ;;  %p4472_p1 = scmp.ne.s32.totalorder %s4459_s28, 0 }
 0x781   : > { %p4473_p2 = scmp.ge.s32.totalorder %s3863_s24, 2  ;;  %s3119_s17 = scalar_lea.sflag [#allocation4], %s3118_s11 }
 0x783   : > { %p3531_p13 = pnand %p4473_p2, %p4472_p1 }
 0x785   : > { %3846 = dma.done.wait (!%p3531_p13), %s3119_s17, 256  }
 0x786   : > { %3848 = vsyncadd (!%p3531_p13), %s3119_s17, 4294967040  ;;  %p21_p9 = scmp.ge.s32.totalorder %s4094_s18, 4   ;;  %s4474_s21 = smov %s3855_s22 }
 0x787   : > { %s4475_s22 = smov %s3859_s23  ;;  %s4476_s23 = smov %s4110_s16 }
 0x788   : > { %s4477_s24 = smov %s4094_s18  ;;  %23 = sbr.rel (!%p21_p9) target bundleno = 7 (0x7), region = 125 }
 0x78f   :  { %3124 = vsyncpa [#allocation3], 1 }
 0x790   :  { %3126 = vsyncpa [#allocation3 + $0x1], 1 }
 0x791   :  { %3127 = vsyncpa [#allocation6], 1 }
 0x792   :  { %3128 = vsyncpa [#allocation9], 1 }
 0x793   :  { %3129 = vsyncpa [#allocation4], 1 }
 0x794   :  { %3131 = vsyncpa [#allocation4 + $0x1], 1 }

</bundles_post_ra>
